<compile_context>
chip_gen: v7x
topology: tpu7x:2x2x1
jax: 0.10.0
libtpu: 0.0.40
codegen_flags: <defaults>
</compile_context>

<pallas_src>
import jax
import jax.numpy as jnp
from jax.experimental import pallas as pl
from jax.experimental.pallas import tpu as pltpu


def _round_up(v: int, m: int) -> int:
    return (v + m - 1) // m * m


def _vmem_capacity_bytes() -> int:
    """Physical VMEM of the local TPU; conservative fallback if unavailable."""
    try:
        info = pltpu.get_tpu_info()
        cap = getattr(info, "vmem_capacity_bytes", None)
        if cap:
            return int(cap)
    except Exception:
        pass
    return 64 * 1024 * 1024  # v7x per-TC VMEM (smallest across generations)


def _yolo_permute_kernel(x_ref, o_ref):
    # x_ref: (A, box_attr, TL)   -- lane-dense loads (TL lanes)
    # o_ref: (A, TL, box_attr)
    # Single whole-block minor-dim swap (batched XLU transpose); one load, one
    # store per block instead of A separate load/transpose/store sequences.
    o_ref[...] = jnp.swapaxes(x_ref[...], -1, -2)


class Yololayer:
    """JAX/Pallas port of the torch Yololayer module."""

    def __init__(self, layer_info: dict, in_width: int, in_height: int, is_train: bool):
        self.n_classes = int(layer_info["classes"])
        self.ignore_thresh = float(layer_info["ignore_thresh"])
        self.box_attr = self.n_classes + 5
        mask_idxes = [int(v) for v in layer_info["mask"].split(",")]
        anchor_all = [int(v) for v in layer_info["anchors"].split(",")]
        anchor_all = [(anchor_all[i], anchor_all[i + 1]) for i in range(0, len(anchor_all), 2)]
        # deterministic "parameters" (anchors), matching the torch init
        self.anchor = jnp.array([anchor_all[i] for i in mask_idxes], dtype=jnp.int32)
        self.in_width = in_width
        self.in_height = in_height
        self.stride = None
        self.lw = None
        self.lh = None
        self.is_train = is_train

    def __call__(self, x):
        B, C, H, W = x.shape
        A = int(self.anchor.shape[0])
        box_attr = self.box_attr
        assert C == A * box_attr, "channel dim must equal n_anchors * (n_classes + 5)"

        # host-side bookkeeping derived from STATIC shapes only (no traced state)
        self.lw, self.lh = W, H
        self.stride = (self.in_width // W, self.in_height // H)

        dtype = x.dtype
        itemsize = dtype.itemsize
        HW = H * W

        vmem_cap = _vmem_capacity_bytes()

        # Spatial tile: multiple of 128 lanes.  Only tile when the full spatial
        # extent would blow the (generation-dependent) VMEM budget; small maps
        # keep a single spatial step (no extra per-step overhead on v5e).
        tl_max = 4096 if vmem_cap >= 96 * 1024 * 1024 else 2048
        if HW <= tl_max:
            TL = HW          # full-extent trailing dims -> no (8,128) constraint issue
        else:
            TL = tl_max      # multiple of 128; partial edge block handled by Pallas
        n_l = pl.cdiv(HW, TL)

        # Real padded VMEM block footprints (lane dim pads to 128, sublane dim
        # to the dtype's packing granule).  The output block pays the
        # 128/box_attr lane-padding inflation -- account for it explicitly.
        sub = 8 * max(1, 4 // itemsize)
        in_block = A * _round_up(box_attr, sub) * _round_up(TL, 128) * itemsize
        out_block = A * _round_up(TL, sub) * _round_up(box_attr, 128) * itemsize
        budget = 2 * (in_block + out_block) + 4 * 1024 * 1024   # double-buffered + headroom
        cap = min(64 * 1024 * 1024, (vmem_cap * 6) // 10)        # <= ~60% of physical VMEM
        vmem_limit = int(min(cap, max(16 * 1024 * 1024, budget)))

        # metadata-only reshape: (B, A*box_attr, H, W) -> (B, A, box_attr, H*W)
        x4 = x.reshape(B, A, box_attr, HW)

        out_flat = pl.pallas_call(
            _yolo_permute_kernel,
            out_shape=jax.ShapeDtypeStruct((B, A, HW, box_attr), dtype),
            grid_spec=pltpu.PrefetchScalarGridSpec(
                num_scalar_prefetch=0,
                grid=(B, n_l),
                in_specs=[
                    pl.BlockSpec(
                        (pl.Squeezed(), A, box_attr, TL),
                        lambda b, l: (b, 0, 0, l),
                    )
                ],
                out_specs=pl.BlockSpec(
                    (pl.Squeezed(), A, TL, box_attr),
                    lambda b, l: (b, 0, l, 0),
                ),
            ),
            compiler_params=pltpu.CompilerParams(
                dimension_semantics=("parallel", "parallel"),
                vmem_limit_bytes=vmem_limit,
            ),
            cost_estimate=pl.CostEstimate(
                flops=0,
                transcendentals=0,
                bytes_accessed=2 * B * C * HW * itemsize,
            ),
        )(x4)

        # metadata-only reshape back to the torch output shape
        return out_flat.reshape(B, A, H, W, box_attr)


def _reference(x, A, box_attr):
    B, C, H, W = x.shape
    return jnp.transpose(x.reshape(B, A, box_attr, H, W), (0, 1, 3, 4, 2))


def _run_case(n_classes, B, H, W, key):
    layer_info = {
        "classes": str(n_classes),
        "ignore_thresh": "0.7",
        "mask": "0,1,2",
        "anchors": "10,13, 16,30, 33,23, 30,61, 62,45, 59,119, 116,90, 156,198, 373,326",
    }
    layer = Yololayer(layer_info, in_width=W * 8, in_height=H * 8, is_train=True)
    A = int(layer.anchor.shape[0])
    C = A * layer.box_attr

    x = jax.random.normal(key, (B, C, H, W), dtype=jnp.float32)
    out = jax.block_until_ready(layer(x))

    ref = _reference(x, A, layer.box_attr)
    assert out.shape == (B, A, H, W, layer.box_attr), out.shape
    assert out.dtype == x.dtype
    assert bool(jnp.array_equal(out, ref)), f"mismatch for case classes={n_classes}, H={H}, W={W}"
    return out


if __name__ == "__main__":
    key = jax.random.PRNGKey(0)
    k1, k2, k3 = jax.random.split(key, 3)

    # Case 1: small deterministic example (3 classes -> box_attr=8, C=24)
    _run_case(n_classes=3, B=2, H=16, W=16, key=k1)

    # Case 2: COCO-like head (80 classes -> box_attr=85, non-multiple-of-8
    # sublanes), H*W not a multiple of 128 -> exercises padded transpose +
    # lane-masked store path.
    _run_case(n_classes=80, B=1, H=26, W=26, key=k2)

    # Case 3: larger feature map (H*W = 5184 > spatial tile) -> exercises the
    # tiled spatial grid axis including the partial edge block.
    _run_case(n_classes=80, B=1, H=72, W=72, key=k3)

    print("KERNEL_OK")
</pallas_src>

<mosaic_0001>
module attributes {stable_mosaic.version = 11 : i64} {
  func.func @_yolo_permute_kernel(%arg0: i32, %arg1: i32, %arg2: memref<1x3x8x256xf32, #tpu.memory_space<vmem>>, %arg3: memref<1x3x256x8xf32, #tpu.memory_space<vmem>>) attributes {dimension_semantics = [#tpu.dimension_semantics<parallel>, #tpu.dimension_semantics<parallel>], iteration_bounds = array<i64: 2, 1>, scalar_prefetch = 0 : i64, scratch_operands = 0 : i64, tpu.core_type = #tpu.core_type<tc>, window_params = [{transform_indices = @transform_0, window_bounds = array<i64: 1, 3, 8, 256>}, {transform_indices = @transform_1, window_bounds = array<i64: 1, 3, 256, 8>}]} {
    %c0 = arith.constant 0 : index
    %c0_0 = arith.constant 0 : index
    %c0_1 = arith.constant 0 : index
    %c0_2 = arith.constant 0 : index
    %0 = vector.load %arg2[%c0, %c0_0, %c0_1, %c0_2] : memref<1x3x8x256xf32, #tpu.memory_space<vmem>>, vector<1x3x8x256xf32>
    %1 = vector.shape_cast %0 : vector<1x3x8x256xf32> to vector<3x8x256xf32>
    %2 = tpu.transpose %1, [0, 2, 1] : vector<3x8x256xf32> -> vector<3x256x8xf32>
    %c0_3 = arith.constant 0 : index
    %c0_4 = arith.constant 0 : index
    %c0_5 = arith.constant 0 : index
    %c0_6 = arith.constant 0 : index
    %3 = vector.load %arg3[%c0_3, %c0_4, %c0_5, %c0_6] : memref<1x3x256x8xf32, #tpu.memory_space<vmem>>, vector<1x3x256x8xf32>
    %4 = vector.shape_cast %3 : vector<1x3x256x8xf32> to vector<3x256x8xf32>
    %5 = vector.shape_cast %2 : vector<3x256x8xf32> to vector<1x3x256x8xf32>
    tpu.vector_store %arg3[%c0_3, %c0_4, %c0_5, %c0_6], %5 {strides = array<i32>} : memref<1x3x256x8xf32, #tpu.memory_space<vmem>>, vector<1x3x256x8xf32>,
    return
  }
  func.func @transform_0(%arg0: i32, %arg1: i32) -> (i32, i32, i32, i32) {
    %c0_i32 = arith.constant 0 : i32
    %c0_i32_0 = arith.constant 0 : i32
    %c0_i32_1 = arith.constant 0 : i32
    return %arg0, %c0_i32, %c0_i32_0, %arg1 : i32, i32, i32, i32
  }
  func.func @transform_1(%arg0: i32, %arg1: i32) -> (i32, i32, i32, i32) {
    %c0_i32 = arith.constant 0 : i32
    %c0_i32_0 = arith.constant 0 : i32
    %c0_i32_1 = arith.constant 0 : i32
    return %arg0, %c0_i32, %arg1, %c0_i32_0 : i32, i32, i32, i32
  }
}

</mosaic_0001>

<bundles_post_ra>
// kernel: tpu_custom_call.1
= control target key start
LH: loop header
LB: loop body
LE: loop exit
PB: predicated region body
PF: predicated region fallthrough
CT: control target
= control target key end

     0   :  { %6 = vsyncpa [#allocation3], 0  ;;  %s1033_s0 = inlined_call_operand.hbm [shape: f32[2,3,8,256], index: 0, kind: input, shape index: {}]   ;;  %s1034_s1 = inlined_call_operand.vmem [shape: f32[2,3,256,8], index: 1, kind: output, shape index: {}]  }
   0x1   :  { %8 = vsyncpa [#allocation3 + $0x1], 0  ;;  %s721_s6 = smov 0   ;;  %s723_s7 = smov 0  }
   0x2   :  { %s725_s8 = smov 0   ;;  %s727_s9 = smov 0  }
   0x3   :  { %s729_s10 = smov 0   ;;  %s731_s11 = smov 0  }
   0x4 LB: > { %s555_s12 = sadd.s32 4294967295, %s706_s11   ;;  %s26_s13 = sadd.s32 1, %s702_s10  ;;  %s706_s11 = sphi %s731_s11, %s14_s11   ;;  %s702_s10 = sphi %s729_s10, %s1041_s10   ;;  %s698_s9 = sphi %s727_s9, %s1040_s9   ;;  %s694_s8 = sphi %s725_s8, %s1039_s8   ;;  %s690_s7 = sphi %s723_s7, %s1038_s7   ;;  %s686_s6 = sphi %s721_s6, %s1037_s6  }
   0x5   : > { %p28_p0 = scmp.ge.s32.totalorder %s26_s13, 2  ;;  %s35_s14 = sadd.s32 1, %s694_s8 }
   0x6   : > { %p42_p1 = scmp.ne.s32.totalorder %s694_s8, %s690_s7  ;;  %p43_p2 = scmp.eq.s32.totalorder %s706_s11, 0 }
   0x7   : > { %s1043_s13 = smov (%p28_p0, %s26_s13), 0  ;;  %p48_p4 = scmp.ne.s32.totalorder %s690_s7, %s686_s6 }
   0x8   : > { %p44_p3 = por %p43_p2, %p42_p1  ;;  %s30_s15 = ssub.s32 %s702_s10, %s1043_s13 }
   0x9   : > { %p49_p5 = scmp.eq.s32.totalorder %s555_s12, 0  ;;  %p33_p6 = scmp.eq.s32.totalorder %s30_s15, 0 }
   0xa   : > { %p574_p8 = scmp.lt.s32.totalorder %s706_s11, 2  ;;  %s100_s18 = sand.u32 1, %s694_s8  }
   0xb   : > { %p760_p7 = por %p49_p5, %p48_p4  ;;  %s565_s19 = smul.u32 768, %s702_s10 }
   0xc   : > { %s766_s17 = scalar_select %p33_p6, %s694_s8, %s35_s14  }
   0xd   : > { %s564_s20 = smul.u32 48, %s100_s18  ;;  %s773_s23 = scalar_lea.hbm %s1033_s0, %s565_s19 }
   0xe   : > { %p775_p9 = pnand %p574_p8, %p44_p3  ;;  %s781_s27 = scalar_lea.sflag [#allocation3], %s100_s18 }
   0xf   : > { %s104_s25 = scalar_lea.vmem [#allocation2], %s564_s20  ;;  %s626_s28 = scalar_lea.hbm %s773_s23, 768 }
  0x10   : > { %s113_s26 = sshll.u32 %s104_s25, 4  ;;  %p627_p10 = scmp.ne.s32.totalorder %s773_s23, %s626_s28  ;;  %s779_s26 = int_to_ptr.vmem [resolvable:$true] %s113_s26 }
  0x11   : > { %p628_p11 = pneg %p775_p9  ;;  %s631_s2 = scalar_lea.hbm %s1033_s0, 1536 }
  0x12   : > { %p632_p0 = scmp.lt.u32.totalorder %s773_s23, %s1033_s0  ;;  %p633_p1 = scmp.lt.u32.totalorder %s631_s2, %s626_s28 }
  0x13   : > { %p629_p12 = pnand %p628_p11, %p627_p10  ;;  %p635_p3 = scmp.lt.u32.totalorder %s626_s28, %s773_s23 }
  0x14   : > { %p634_p2 = por %p633_p1, %p632_p0 }
  0x15   : > { %p630_p13 = pneg %p629_p12 }
  0x16   : > { %p636_p4 = por %p635_p3, %p634_p2 }
  0x18   : > { %p637_p5 = pnand %p636_p4, %p630_p13 }
  0x1a   : > { %640 = shalt.err (!%p637_p5)
}
  0x1b   : > { %s641_s5 = scalar_lea.vmem %s779_s26, 768  ;;  %s708_s6 = smov [#allocation2]  }
  0x1c   : > { %p642_p6 = scmp.ne.s32.totalorder %s779_s26, %s641_s5  ;;  %s646_s12 = sshll.u32 %s708_s6, 4  ;;  %s647_s12 = int_to_ptr.vmem [resolvable:$false] %s646_s12 }
  0x1d   : > { %s648_s14 = scalar_lea.vmem %s647_s12, 1536  ;;  %p649_p12 = scmp.lt.s32.totalorder %s779_s26, %s647_s12 }
  0x1e   : > { %p644_p8 = pnand %p642_p6, %p628_p11  ;;  %p650_p0 = scmp.lt.s32.totalorder %s648_s14, %s641_s5 }
  0x20   : > { %p645_p10 = pneg %p644_p8  ;;  %p651_p1 = por %p650_p0, %p649_p12 }
  0x22   : > { %p652_p2 = pnand %p651_p1, %p645_p10 }
  0x24   : > { %655 = shalt.err (!%p652_p2)
}
  0x25   : > { %s709_s15 = smov 256   ;;  %s710_s18 = smov 16  }
  0x26   : > { %573 = dma.hbm_to_vmem [thread:$0]  (!%p775_p9), %s773_s23, 768, %s779_s26, %s781_s27, %s709_s15, %s709_s15, %s710_s18  }
  0x27   : > { %p560_p11 = scmp.ge.s32.totalorder %s706_s11, 1  ;;  %p121_p13 = scmp.lt.s32.totalorder %s706_s11, 3 }
  0x29   : > { %p122_p3 = pnand %p560_p11, %p121_p13 }
  0x2a   : > { %s127_s19 = sand.u32 (!%p122_p3), 1, %s690_s7  }
  0x2b   : > { %125 = sbr.rel (%p122_p3) target bundleno = 370 (0x172), region = 24  ;;  %s128_s21 = scalar_lea.sflag (!%p122_p3), [#allocation3], %s127_s19 }
  0x2c   : > { %s566_s20 = smul.u32 (!%p122_p3), 48, %s127_s19 }
  0x2e   : > { %s131_s22 = scalar_lea.vmem (!%p122_p3), [#allocation2], %s566_s20 }
  0x32   : > { %681 = dma.done.wait (%p760_p7), %s128_s21, 768  }
  0x33   : > { %683 = vsyncadd (%p760_p7), %s128_s21, 4294966528  ;;  %v167_v0 = vld [vmem:[%s131_s22 + $0x10] sm:$0xff]  ;;  %v165_v1 = vld [vmem:[%s131_s22] sm:$0xff]  ;;  %p156_p9 = scmp.lt.s32.totalorder %s698_s9, 1  ;;  %vm363_vm0 = vcmask 64512  }
  0x34   : > { %235 = vxpose.xlu1.b32.start.end [1/1] (short) %v167_v0, 128  ;;  %171 = vxpose.xlu0.b32.start.end [1/1] (short) %v165_v1, 128  ;;  %v168_v2 = vld [vmem:[%s131_s22 + $0x18] sm:$0xff]  ;;  %v166_v3 = vld [vmem:[%s131_s22 + $0x8] sm:$0xff]  ;;  %v169_v5 = vld [vmem:[%s131_s22 + $0x20] sm:$0xff] }
  0x35   : > { %s1045_s9 = smov (!%p156_p9, %s698_s9), 1  ;;  %v170_v4 = vld [vmem:[%s131_s22 + $0x28] sm:$0xff] }
  0x36   : > { %s567_s23 = smul.u32 768, %s1045_s9 }
  0x38   : > { %s821_s25 = scalar_lea.vmem %s1034_s1, %s567_s23 }
  0x71   : > { %267 = vxpose.xlu1.b32.start.end [1/1] (short) %v168_v2, 128  ;;  %203 = vxpose.xlu0.b32.start.end [1/1] (short) %v166_v3, 128 }
  0xae   : > { %331 = vxpose.xlu1.b32.start.end [1/1] (short) %v170_v4, 128  ;;  %299 = vxpose.xlu0.b32.start.end [1/1] (short) %v169_v5, 128 }
  0xb4   : > { %v251_v6 = vpop.trf.xlu1  ;;  %v187_v7 = vpop.trf.xlu0 }
  0xb5   : > { %396 = vst.msk [vmem:[%s821_s25 + $0x100] sm:$0xff] %vm363_vm0, %v251_v6  ;;  %364 = vst.msk [vmem:[%s821_s25] sm:$0xff] %vm363_vm0, %v187_v7 }
  0xb8   : > { %v252_v8 = vpop.trf.xlu1  ;;  %v188_v9 = vpop.trf.xlu0 }
  0xb9   : > { %397 = vst.msk [vmem:[%s821_s25 + $0x108] sm:$0xff] %vm363_vm0, %v252_v8  ;;  %365 = vst.msk [vmem:[%s821_s25 + $0x8] sm:$0xff] %vm363_vm0, %v188_v9 }
  0xbc   : > { %v253_v10 = vpop.trf.xlu1  ;;  %v189_v11 = vpop.trf.xlu0 }
  0xbd   : > { %398 = vst.msk [vmem:[%s821_s25 + $0x110] sm:$0xff] %vm363_vm0, %v253_v10  ;;  %366 = vst.msk [vmem:[%s821_s25 + $0x10] sm:$0xff] %vm363_vm0, %v189_v11 }
  0xc0   : > { %v254_v12 = vpop.trf.xlu1  ;;  %v190_v13 = vpop.trf.xlu0 }
  0xc1   : > { %399 = vst.msk [vmem:[%s821_s25 + $0x118] sm:$0xff] %vm363_vm0, %v254_v12  ;;  %367 = vst.msk [vmem:[%s821_s25 + $0x18] sm:$0xff] %vm363_vm0, %v190_v13 }
  0xc4   : > { %v255_v14 = vpop.trf.xlu1  ;;  %v191_v15 = vpop.trf.xlu0 }
  0xc5   : > { %400 = vst.msk [vmem:[%s821_s25 + $0x120] sm:$0xff] %vm363_vm0, %v255_v14  ;;  %368 = vst.msk [vmem:[%s821_s25 + $0x20] sm:$0xff] %vm363_vm0, %v191_v15 }
  0xc8   : > { %v256_v16 = vpop.trf.xlu1  ;;  %v192_v17 = vpop.trf.xlu0 }
  0xc9   : > { %401 = vst.msk [vmem:[%s821_s25 + $0x128] sm:$0xff] %vm363_vm0, %v256_v16  ;;  %369 = vst.msk [vmem:[%s821_s25 + $0x28] sm:$0xff] %vm363_vm0, %v192_v17 }
  0xcc   : > { %v257_v18 = vpop.trf.xlu1  ;;  %v193_v19 = vpop.trf.xlu0 }
  0xcd   : > { %402 = vst.msk [vmem:[%s821_s25 + $0x130] sm:$0xff] %vm363_vm0, %v257_v18  ;;  %370 = vst.msk [vmem:[%s821_s25 + $0x30] sm:$0xff] %vm363_vm0, %v193_v19 }
  0xd0   : > { %v258_v20 = vpop.trf.xlu1  ;;  %v194_v21 = vpop.trf.xlu0 }
  0xd1   : > { %403 = vst.msk [vmem:[%s821_s25 + $0x138] sm:$0xff] %vm363_vm0, %v258_v20  ;;  %371 = vst.msk [vmem:[%s821_s25 + $0x38] sm:$0xff] %vm363_vm0, %v194_v21 }
  0xd4   : > { %v259_v22 = vpop.trf.xlu1  ;;  %v195_v23 = vpop.trf.xlu0 }
  0xd5   : > { %404 = vst.msk [vmem:[%s821_s25 + $0x140] sm:$0xff] %vm363_vm0, %v259_v22  ;;  %372 = vst.msk [vmem:[%s821_s25 + $0x40] sm:$0xff] %vm363_vm0, %v195_v23 }
  0xd8   : > { %v260_v24 = vpop.trf.xlu1  ;;  %v196_v25 = vpop.trf.xlu0 }
  0xd9   : > { %405 = vst.msk [vmem:[%s821_s25 + $0x148] sm:$0xff] %vm363_vm0, %v260_v24  ;;  %373 = vst.msk [vmem:[%s821_s25 + $0x48] sm:$0xff] %vm363_vm0, %v196_v25 }
  0xdc   : > { %v261_v26 = vpop.trf.xlu1  ;;  %v197_v27 = vpop.trf.xlu0 }
  0xdd   : > { %406 = vst.msk [vmem:[%s821_s25 + $0x150] sm:$0xff] %vm363_vm0, %v261_v26  ;;  %374 = vst.msk [vmem:[%s821_s25 + $0x50] sm:$0xff] %vm363_vm0, %v197_v27 }
  0xe0   : > { %v262_v28 = vpop.trf.xlu1  ;;  %v198_v29 = vpop.trf.xlu0 }
  0xe1   : > { %407 = vst.msk [vmem:[%s821_s25 + $0x158] sm:$0xff] %vm363_vm0, %v262_v28  ;;  %375 = vst.msk [vmem:[%s821_s25 + $0x58] sm:$0xff] %vm363_vm0, %v198_v29 }
  0xe4   : > { %v263_v30 = vpop.trf.xlu1  ;;  %v199_v31 = vpop.trf.xlu0 }
  0xe5   : > { %408 = vst.msk [vmem:[%s821_s25 + $0x160] sm:$0xff] %vm363_vm0, %v263_v30  ;;  %376 = vst.msk [vmem:[%s821_s25 + $0x60] sm:$0xff] %vm363_vm0, %v199_v31 }
  0xe8   : > { %v264_v32 = vpop.trf.xlu1  ;;  %v200_v33 = vpop.trf.xlu0 }
  0xe9   : > { %409 = vst.msk [vmem:[%s821_s25 + $0x168] sm:$0xff] %vm363_vm0, %v264_v32  ;;  %377 = vst.msk [vmem:[%s821_s25 + $0x68] sm:$0xff] %vm363_vm0, %v200_v33 }
  0xec   : > { %v265_v34 = vpop.trf.xlu1  ;;  %v201_v35 = vpop.trf.xlu0 }
  0xed   : > { %410 = vst.msk [vmem:[%s821_s25 + $0x170] sm:$0xff] %vm363_vm0, %v265_v34  ;;  %378 = vst.msk [vmem:[%s821_s25 + $0x70] sm:$0xff] %vm363_vm0, %v201_v35 }
  0xf0   : > { %v266_v36 = vpop.trf.xlu1  ;;  %v202_v37 = vpop.trf.xlu0 }
  0xf1   : > { %411 = vst.msk [vmem:[%s821_s25 + $0x178] sm:$0xff] %vm363_vm0, %v266_v36  ;;  %379 = vst.msk [vmem:[%s821_s25 + $0x78] sm:$0xff] %vm363_vm0, %v202_v37 }
  0xf4   : > { %v283_v38 = vpop.trf.xlu1  ;;  %v219_v39 = vpop.trf.xlu0 }
  0xf5   : > { %412 = vst.msk [vmem:[%s821_s25 + $0x180] sm:$0xff] %vm363_vm0, %v283_v38  ;;  %380 = vst.msk [vmem:[%s821_s25 + $0x80] sm:$0xff] %vm363_vm0, %v219_v39 }
  0xf8   : > { %v284_v40 = vpop.trf.xlu1  ;;  %v220_v41 = vpop.trf.xlu0 }
  0xf9   : > { %413 = vst.msk [vmem:[%s821_s25 + $0x188] sm:$0xff] %vm363_vm0, %v284_v40  ;;  %381 = vst.msk [vmem:[%s821_s25 + $0x88] sm:$0xff] %vm363_vm0, %v220_v41 }
  0xfc   : > { %v285_v42 = vpop.trf.xlu1  ;;  %v221_v43 = vpop.trf.xlu0 }
  0xfd   : > { %414 = vst.msk [vmem:[%s821_s25 + $0x190] sm:$0xff] %vm363_vm0, %v285_v42  ;;  %382 = vst.msk [vmem:[%s821_s25 + $0x90] sm:$0xff] %vm363_vm0, %v221_v43 }
 0x100   : > { %v286_v44 = vpop.trf.xlu1  ;;  %v222_v45 = vpop.trf.xlu0 }
 0x101   : > { %415 = vst.msk [vmem:[%s821_s25 + $0x198] sm:$0xff] %vm363_vm0, %v286_v44  ;;  %383 = vst.msk [vmem:[%s821_s25 + $0x98] sm:$0xff] %vm363_vm0, %v222_v45 }
 0x104   : > { %v287_v46 = vpop.trf.xlu1  ;;  %v223_v47 = vpop.trf.xlu0 }
 0x105   : > { %416 = vst.msk [vmem:[%s821_s25 + $0x1a0] sm:$0xff] %vm363_vm0, %v287_v46  ;;  %384 = vst.msk [vmem:[%s821_s25 + $0xa0] sm:$0xff] %vm363_vm0, %v223_v47 }
 0x108   : > { %v288_v48 = vpop.trf.xlu1  ;;  %v224_v49 = vpop.trf.xlu0 }
 0x109   : > { %417 = vst.msk [vmem:[%s821_s25 + $0x1a8] sm:$0xff] %vm363_vm0, %v288_v48  ;;  %385 = vst.msk [vmem:[%s821_s25 + $0xa8] sm:$0xff] %vm363_vm0, %v224_v49 }
 0x10c   : > { %v289_v50 = vpop.trf.xlu1  ;;  %v225_v51 = vpop.trf.xlu0 }
 0x10d   : > { %418 = vst.msk [vmem:[%s821_s25 + $0x1b0] sm:$0xff] %vm363_vm0, %v289_v50  ;;  %386 = vst.msk [vmem:[%s821_s25 + $0xb0] sm:$0xff] %vm363_vm0, %v225_v51 }
 0x110   : > { %v290_v52 = vpop.trf.xlu1  ;;  %v226_v53 = vpop.trf.xlu0 }
 0x111   : > { %419 = vst.msk [vmem:[%s821_s25 + $0x1b8] sm:$0xff] %vm363_vm0, %v290_v52  ;;  %387 = vst.msk [vmem:[%s821_s25 + $0xb8] sm:$0xff] %vm363_vm0, %v226_v53 }
 0x114   : > { %v291_v54 = vpop.trf.xlu1  ;;  %v227_v55 = vpop.trf.xlu0 }
 0x115   : > { %420 = vst.msk [vmem:[%s821_s25 + $0x1c0] sm:$0xff] %vm363_vm0, %v291_v54  ;;  %388 = vst.msk [vmem:[%s821_s25 + $0xc0] sm:$0xff] %vm363_vm0, %v227_v55 }
 0x118   : > { %v292_v56 = vpop.trf.xlu1  ;;  %v228_v57 = vpop.trf.xlu0 }
 0x119   : > { %421 = vst.msk [vmem:[%s821_s25 + $0x1c8] sm:$0xff] %vm363_vm0, %v292_v56  ;;  %389 = vst.msk [vmem:[%s821_s25 + $0xc8] sm:$0xff] %vm363_vm0, %v228_v57 }
 0x11c   : > { %v293_v58 = vpop.trf.xlu1  ;;  %v229_v59 = vpop.trf.xlu0 }
 0x11d   : > { %422 = vst.msk [vmem:[%s821_s25 + $0x1d0] sm:$0xff] %vm363_vm0, %v293_v58  ;;  %390 = vst.msk [vmem:[%s821_s25 + $0xd0] sm:$0xff] %vm363_vm0, %v229_v59 }
 0x120   : > { %v294_v60 = vpop.trf.xlu1  ;;  %v230_v61 = vpop.trf.xlu0 }
 0x121   : > { %423 = vst.msk [vmem:[%s821_s25 + $0x1d8] sm:$0xff] %vm363_vm0, %v294_v60  ;;  %391 = vst.msk [vmem:[%s821_s25 + $0xd8] sm:$0xff] %vm363_vm0, %v230_v61 }
 0x124   : > { %v295_v62 = vpop.trf.xlu1  ;;  %v231_v63 = vpop.trf.xlu0 }
 0x125   : > { %424 = vst.msk [vmem:[%s821_s25 + $0x1e0] sm:$0xff] %vm363_vm0, %v295_v62  ;;  %392 = vst.msk [vmem:[%s821_s25 + $0xe0] sm:$0xff] %vm363_vm0, %v231_v63 }
 0x128   : > { %v296_v0 = vpop.trf.xlu1  ;;  %v232_v1 = vpop.trf.xlu0 }
 0x129   : > { %425 = vst.msk [vmem:[%s821_s25 + $0x1e8] sm:$0xff] %vm363_vm0, %v296_v0  ;;  %393 = vst.msk [vmem:[%s821_s25 + $0xe8] sm:$0xff] %vm363_vm0, %v232_v1 }
 0x12c   : > { %v297_v2 = vpop.trf.xlu1  ;;  %v233_v3 = vpop.trf.xlu0 }
 0x12d   : > { %426 = vst.msk [vmem:[%s821_s25 + $0x1f0] sm:$0xff] %vm363_vm0, %v297_v2  ;;  %394 = vst.msk [vmem:[%s821_s25 + $0xf0] sm:$0xff] %vm363_vm0, %v233_v3 }
 0x130   : > { %v298_v4 = vpop.trf.xlu1  ;;  %v234_v5 = vpop.trf.xlu0 }
 0x131   : > { %427 = vst.msk [vmem:[%s821_s25 + $0x1f8] sm:$0xff] %vm363_vm0, %v298_v4  ;;  %395 = vst.msk [vmem:[%s821_s25 + $0xf8] sm:$0xff] %vm363_vm0, %v234_v5 }
 0x134   : > { %v347_v6 = vpop.trf.xlu1  ;;  %v315_v7 = vpop.trf.xlu0 }
 0x135   : > { %444 = vst.msk [vmem:[%s821_s25 + $0x280] sm:$0xff] %vm363_vm0, %v347_v6  ;;  %428 = vst.msk [vmem:[%s821_s25 + $0x200] sm:$0xff] %vm363_vm0, %v315_v7 }
 0x138   : > { %v348_v8 = vpop.trf.xlu1  ;;  %v316_v9 = vpop.trf.xlu0 }
 0x139   : > { %445 = vst.msk [vmem:[%s821_s25 + $0x288] sm:$0xff] %vm363_vm0, %v348_v8  ;;  %429 = vst.msk [vmem:[%s821_s25 + $0x208] sm:$0xff] %vm363_vm0, %v316_v9 }
 0x13c   : > { %v349_v10 = vpop.trf.xlu1  ;;  %v317_v11 = vpop.trf.xlu0 }
 0x13d   : > { %446 = vst.msk [vmem:[%s821_s25 + $0x290] sm:$0xff] %vm363_vm0, %v349_v10  ;;  %430 = vst.msk [vmem:[%s821_s25 + $0x210] sm:$0xff] %vm363_vm0, %v317_v11 }
 0x140   : > { %v350_v12 = vpop.trf.xlu1  ;;  %v318_v13 = vpop.trf.xlu0 }
 0x141   : > { %447 = vst.msk [vmem:[%s821_s25 + $0x298] sm:$0xff] %vm363_vm0, %v350_v12  ;;  %431 = vst.msk [vmem:[%s821_s25 + $0x218] sm:$0xff] %vm363_vm0, %v318_v13 }
 0x144   : > { %v351_v14 = vpop.trf.xlu1  ;;  %v319_v15 = vpop.trf.xlu0 }
 0x145   : > { %448 = vst.msk [vmem:[%s821_s25 + $0x2a0] sm:$0xff] %vm363_vm0, %v351_v14  ;;  %432 = vst.msk [vmem:[%s821_s25 + $0x220] sm:$0xff] %vm363_vm0, %v319_v15 }
 0x148   : > { %v352_v16 = vpop.trf.xlu1  ;;  %v320_v17 = vpop.trf.xlu0 }
 0x149   : > { %449 = vst.msk [vmem:[%s821_s25 + $0x2a8] sm:$0xff] %vm363_vm0, %v352_v16  ;;  %433 = vst.msk [vmem:[%s821_s25 + $0x228] sm:$0xff] %vm363_vm0, %v320_v17 }
 0x14c   : > { %v353_v18 = vpop.trf.xlu1  ;;  %v321_v19 = vpop.trf.xlu0 }
 0x14d   : > { %450 = vst.msk [vmem:[%s821_s25 + $0x2b0] sm:$0xff] %vm363_vm0, %v353_v18  ;;  %434 = vst.msk [vmem:[%s821_s25 + $0x230] sm:$0xff] %vm363_vm0, %v321_v19 }
 0x150   : > { %v354_v20 = vpop.trf.xlu1  ;;  %v322_v21 = vpop.trf.xlu0 }
 0x151   : > { %451 = vst.msk [vmem:[%s821_s25 + $0x2b8] sm:$0xff] %vm363_vm0, %v354_v20  ;;  %435 = vst.msk [vmem:[%s821_s25 + $0x238] sm:$0xff] %vm363_vm0, %v322_v21 }
 0x154   : > { %v355_v22 = vpop.trf.xlu1  ;;  %v323_v23 = vpop.trf.xlu0 }
 0x155   : > { %452 = vst.msk [vmem:[%s821_s25 + $0x2c0] sm:$0xff] %vm363_vm0, %v355_v22  ;;  %436 = vst.msk [vmem:[%s821_s25 + $0x240] sm:$0xff] %vm363_vm0, %v323_v23 }
 0x158   : > { %v356_v24 = vpop.trf.xlu1  ;;  %v324_v25 = vpop.trf.xlu0 }
 0x159   : > { %453 = vst.msk [vmem:[%s821_s25 + $0x2c8] sm:$0xff] %vm363_vm0, %v356_v24  ;;  %437 = vst.msk [vmem:[%s821_s25 + $0x248] sm:$0xff] %vm363_vm0, %v324_v25 }
 0x15c   : > { %v357_v26 = vpop.trf.xlu1  ;;  %v325_v27 = vpop.trf.xlu0 }
 0x15d   : > { %454 = vst.msk [vmem:[%s821_s25 + $0x2d0] sm:$0xff] %vm363_vm0, %v357_v26  ;;  %438 = vst.msk [vmem:[%s821_s25 + $0x250] sm:$0xff] %vm363_vm0, %v325_v27 }
 0x160   : > { %v358_v28 = vpop.trf.xlu1  ;;  %v326_v29 = vpop.trf.xlu0 }
 0x161   : > { %455 = vst.msk [vmem:[%s821_s25 + $0x2d8] sm:$0xff] %vm363_vm0, %v358_v28  ;;  %439 = vst.msk [vmem:[%s821_s25 + $0x258] sm:$0xff] %vm363_vm0, %v326_v29 }
 0x164   : > { %v359_v30 = vpop.trf.xlu1  ;;  %v327_v31 = vpop.trf.xlu0 }
 0x165   : > { %456 = vst.msk [vmem:[%s821_s25 + $0x2e0] sm:$0xff] %vm363_vm0, %v359_v30  ;;  %440 = vst.msk [vmem:[%s821_s25 + $0x260] sm:$0xff] %vm363_vm0, %v327_v31 }
 0x168   : > { %v360_v32 = vpop.trf.xlu1  ;;  %v328_v33 = vpop.trf.xlu0 }
 0x169   : > { %457 = vst.msk [vmem:[%s821_s25 + $0x2e8] sm:$0xff] %vm363_vm0, %v360_v32  ;;  %441 = vst.msk [vmem:[%s821_s25 + $0x268] sm:$0xff] %vm363_vm0, %v328_v33 }
 0x16c   : > { %v361_v34 = vpop.trf.xlu1  ;;  %v329_v35 = vpop.trf.xlu0 }
 0x16d   : > { %458 = vst.msk [vmem:[%s821_s25 + $0x2f0] sm:$0xff] %vm363_vm0, %v361_v34  ;;  %442 = vst.msk [vmem:[%s821_s25 + $0x270] sm:$0xff] %vm363_vm0, %v329_v35 }
 0x170   : > { %v362_v36 = vpop.trf.xlu1  ;;  %v330_v37 = vpop.trf.xlu0 }
 0x171   : > { %459 = vst.msk [vmem:[%s821_s25 + $0x2f8] sm:$0xff] %vm363_vm0, %v362_v36  ;;  %443 = vst.msk [vmem:[%s821_s25 + $0x278] sm:$0xff] %vm363_vm0, %v330_v37 }
 0x172 PF: > { %s14_s11 = sadd.s32 1, %s706_s11   ;;  %s1037_s6 = smov %s690_s7 }
 0x173   : > { %p11_p7 = scmp.ge.s32.totalorder %s14_s11, 4   ;;  %s1038_s7 = smov %s694_s8 }
 0x174   : > { %s1039_s8 = smov %s766_s17  ;;  %s1040_s9 = smov %s702_s10 }
 0x175   : > { %s1041_s10 = smov %s1043_s13  ;;  %13 = sbr.rel (!%p11_p7) target bundleno = 4 (0x4), region = 64 }
 0x17c   :  { %490 = vsyncpa [#allocation3], 1 }
 0x17d   :  { %492 = vsyncpa [#allocation3 + $0x1], 1 }

</bundles_post_ra>
